<compile_context>
chip_gen: v6e
topology: v6e:2x2x1
jax: 0.10.0
libtpu: 0.0.40
codegen_flags: <defaults>
</compile_context>

<pallas_src>
import jax
import jax.numpy as jnp
from jax.experimental import pallas as pl
from jax.experimental.pallas import tpu as pltpu

D_IN, H1, H2, D_OUT = 28 * 28, 128, 64, 10
OUT_PAD = 128  # lane-dense padded output width


def _round_up(x, m):
    return ((x + m - 1) // m) * m


def mlp_kernel(x_ref, w1_ref, b1_ref, w2_ref, b2_ref, w3_ref, b3_ref, o_ref):
    # x_ref: (TB, 784) float32 tile of the batch.  Cast to bf16 here (hidden under
    # the x DMA); weights are bf16 and VMEM-resident; biases f32.  All matmuls
    # accumulate in f32 on the MXU.
    x = x_ref[...].astype(jnp.bfloat16)

    h1 = jnp.dot(x, w1_ref[...], preferred_element_type=jnp.float32) + b1_ref[...]
    h1 = jnp.maximum(h1, 0.0).astype(jnp.bfloat16)  # ReLU/bias in f32, bf16 for next LHS

    h2 = jnp.dot(h1, w2_ref[...], preferred_element_type=jnp.float32) + b2_ref[...]
    h2 = jnp.maximum(h2, 0.0).astype(jnp.bfloat16)

    # w3/b3 are zero-padded to 128 output lanes -> lane-dense (unmasked) store.
    y = jnp.dot(h2, w3_ref[...], preferred_element_type=jnp.float32) + b3_ref[...]
    o_ref[...] = y.astype(o_ref.dtype)


def prepare_params(params):
    """One-time param prep (call at init, reuse across forward calls).

    Input: PyTorch-style params with weights already laid out as (in, out).
    Output: bf16 weights (layer 3 zero-padded to 128 output lanes), f32 biases.
    """
    w1, b1, w2, b2, w3, b3 = params
    w1b = w1.astype(jnp.bfloat16)
    w2b = w2.astype(jnp.bfloat16)
    w3b = jnp.pad(w3.astype(jnp.float32),
                  ((0, 0), (0, OUT_PAD - D_OUT))).astype(jnp.bfloat16)
    b1f = b1.astype(jnp.float32).reshape(1, H1)
    b2f = b2.astype(jnp.float32).reshape(1, H2)
    b3f = jnp.pad(b3.astype(jnp.float32).reshape(1, D_OUT),
                  ((0, 0), (0, OUT_PAD - D_OUT)))
    return (w1b, b1f, w2b, b2f, w3b, b3f)


def digit_mlp_forward(x_nchw, prepared_params, *, batch_tile=1024):
    """x_nchw: (B, 1, 28, 28) float32 -> logits (B, 10) float32.

    `prepared_params` is the output of prepare_params() (hoisted weight prep).
    """
    w1b, b1f, w2b, b2f, w3b, b3f = prepared_params
    B = x_nchw.shape[0]

    # nn.Flatten(): row-major flatten of all dims except batch (free metadata op).
    # x stays float32 -- the bf16 cast happens inside the kernel.
    x = x_nchw.reshape(B, D_IN)

    # Pad only the tail to a multiple of 8 rows (native f32 sublane); no-op when
    # B % 8 == 0, so the common large-batch path pays no extra HBM pass.
    b8 = _round_up(B, 8)
    if b8 != B:
        x = jnp.pad(x, ((0, b8 - B), (0, 0)))

    # Batch tile: large enough to amortize per-step overhead (~0.35 us), small
    # enough to fit v5e's 16 MiB scoped-VMEM default double-buffered.
    tb = min(batch_tile, b8)
    grid = (pl.cdiv(b8, tb),)  # ragged last block handled by Pallas read/write masking

    # Batch-tiled x / out; weights & biases have constant index maps -> resident.
    x_spec = pl.BlockSpec((tb, D_IN), lambda i: (i, 0))
    out_spec = pl.BlockSpec((tb, OUT_PAD), lambda i: (i, 0))
    const = lambda shape: pl.BlockSpec(shape, lambda i: (0, 0))

    out_padded = pl.pallas_call(
        mlp_kernel,
        out_shape=jax.ShapeDtypeStruct((b8, OUT_PAD), jnp.float32),
        grid=grid,
        in_specs=[
            x_spec,
            const(w1b.shape), const(b1f.shape),
            const(w2b.shape), const(b2f.shape),
            const(w3b.shape), const(b3f.shape),
        ],
        out_specs=out_spec,
        compiler_params=pltpu.CompilerParams(
            dimension_semantics=("parallel",),
        ),
    )(x, w1b, b1f, w2b, b2f, w3b, b3f)

    # Preserve the module's forward semantics: (B, 10) float32 logits.
    # (Perf-sensitive callers may consume out_padded[:, :10] columns directly.)
    return out_padded[:B, :D_OUT]


def init_params(key):
    """Deterministic init. Weights are (in, out) = PyTorch Linear weight transposed."""
    k = jax.random.split(key, 6)

    def linear(kw, kb, fan_in, fan_out):
        # Match PyTorch's default U(-1/sqrt(fan_in), 1/sqrt(fan_in)) init.
        bound = 1.0 / jnp.sqrt(fan_in)
        w = jax.random.uniform(kw, (fan_in, fan_out), jnp.float32, -bound, bound)
        b = jax.random.uniform(kb, (1, fan_out), jnp.float32, -bound, bound)
        return w, b

    w1, b1 = linear(k[0], k[1], D_IN, H1)
    w2, b2 = linear(k[2], k[3], H1, H2)
    w3, b3 = linear(k[4], k[5], H2, D_OUT)
    return (w1, b1, w2, b2, w3, b3)


if __name__ == "__main__":
    key = jax.random.PRNGKey(0)
    k_params, k_x = jax.random.split(key)

    params = init_params(k_params)
    prepared = prepare_params(params)  # hoisted one-time weight prep

    # Small batch, MNIST-like NCHW input: (B=2, C=1, H=28, W=28).
    B = 2
    x = jax.random.normal(k_x, (B, 1, 28, 28), dtype=jnp.float32)

    logits = digit_mlp_forward(x, prepared)
    jax.block_until_ready(logits)

    # Reference with the same bf16-operand / f32-accumulation math as the kernel.
    w1, b1, w2, b2, w3, b3 = params
    xf = x.reshape(B, D_IN).astype(jnp.bfloat16)
    h = jnp.dot(xf, w1.astype(jnp.bfloat16), preferred_element_type=jnp.float32) + b1
    h = jnp.maximum(h, 0.0).astype(jnp.bfloat16)
    h = jnp.dot(h, w2.astype(jnp.bfloat16), preferred_element_type=jnp.float32) + b2
    h = jnp.maximum(h, 0.0).astype(jnp.bfloat16)
    ref = jnp.dot(h, w3.astype(jnp.bfloat16), preferred_element_type=jnp.float32) + b3

    assert logits.shape == (B, D_OUT)
    assert jnp.allclose(logits, ref, atol=2e-2, rtol=2e-2), (
        float(jnp.max(jnp.abs(logits - ref))))

    print("KERNEL_OK")
</pallas_src>

<mosaic_0001>
module attributes {stable_mosaic.version = 11 : i64} {
  func.func @mlp_kernel(%arg0: i32, %arg1: memref<8x784xf32, #tpu.memory_space<vmem>>, %arg2: memref<784x128xbf16, #tpu.memory_space<vmem>>, %arg3: memref<1x128xf32, #tpu.memory_space<vmem>>, %arg4: memref<128x64xbf16, #tpu.memory_space<vmem>>, %arg5: memref<1x64xf32, #tpu.memory_space<vmem>>, %arg6: memref<64x128xbf16, #tpu.memory_space<vmem>>, %arg7: memref<1x128xf32, #tpu.memory_space<vmem>>, %arg8: memref<8x128xf32, #tpu.memory_space<vmem>>) attributes {dimension_semantics = [#tpu.dimension_semantics<parallel>], iteration_bounds = array<i64: 1>, scalar_prefetch = 0 : i64, scratch_operands = 0 : i64, tpu.core_type = #tpu.core_type<tc>, window_params = [{transform_indices = @transform_0, window_bounds = array<i64: 8, 784>}, {pipeline_mode = #tpu.pipeline_mode<synchronous>, transform_indices = @transform_1, window_bounds = array<i64: 784, 128>}, {pipeline_mode = #tpu.pipeline_mode<synchronous>, transform_indices = @transform_2, window_bounds = array<i64: 1, 128>}, {pipeline_mode = #tpu.pipeline_mode<synchronous>, transform_indices = @transform_3, window_bounds = array<i64: 128, 64>}, {pipeline_mode = #tpu.pipeline_mode<synchronous>, transform_indices = @transform_4, window_bounds = array<i64: 1, 64>}, {pipeline_mode = #tpu.pipeline_mode<synchronous>, transform_indices = @transform_5, window_bounds = array<i64: 64, 128>}, {pipeline_mode = #tpu.pipeline_mode<synchronous>, transform_indices = @transform_6, window_bounds = array<i64: 1, 128>}, {transform_indices = @transform_7, window_bounds = array<i64: 8, 128>}]} {
    %c0 = arith.constant 0 : index
    %c0_0 = arith.constant 0 : index
    %0 = vector.load %arg1[%c0, %c0_0] : memref<8x784xf32, #tpu.memory_space<vmem>>, vector<8x784xf32>
    %1 = arith.truncf %0 : vector<8x784xf32> to vector<8x784xbf16>
    %c0_1 = arith.constant 0 : index
    %c0_2 = arith.constant 0 : index
    %2 = vector.load %arg2[%c0_1, %c0_2] : memref<784x128xbf16, #tpu.memory_space<vmem>>, vector<784x128xbf16>
    %cst = arith.constant dense<0.000000e+00> : vector<8x128xf32>
    %3 = tpu.matmul %1, %2, %cst {dimension_numbers = #tpu.dot_dimension_numbers<[1], [0], [0], [1], [0, 0, 1, 1], [], []>} : vector<8x784xbf16>, vector<784x128xbf16>, vector<8x128xf32> -> vector<8x128xf32>
    %c0_3 = arith.constant 0 : index
    %c0_4 = arith.constant 0 : index
    %4 = vector.load %arg3[%c0_3, %c0_4] : memref<1x128xf32, #tpu.memory_space<vmem>>, vector<1x128xf32>
    %5 = vector.broadcast %4 : vector<1x128xf32> to vector<8x128xf32>
    %6 = arith.addf %3, %5 : vector<8x128xf32>
    %cst_5 = arith.constant 0.000000e+00 : f32
    %7 = vector.broadcast %cst_5 : f32 to vector<8x128xf32>
    %8 = arith.maximumf %6, %7 : vector<8x128xf32>
    %9 = arith.truncf %8 : vector<8x128xf32> to vector<8x128xbf16>
    %c0_6 = arith.constant 0 : index
    %c0_7 = arith.constant 0 : index
    %10 = vector.load %arg4[%c0_6, %c0_7] : memref<128x64xbf16, #tpu.memory_space<vmem>>, vector<128x64xbf16>
    %cst_8 = arith.constant dense<0.000000e+00> : vector<8x64xf32>
    %11 = tpu.matmul %9, %10, %cst_8 {dimension_numbers = #tpu.dot_dimension_numbers<[1], [0], [0], [1], [0, 0, 1, 1], [], []>} : vector<8x128xbf16>, vector<128x64xbf16>, vector<8x64xf32> -> vector<8x64xf32>
    %c0_9 = arith.constant 0 : index
    %c0_10 = arith.constant 0 : index
    %12 = vector.load %arg5[%c0_9, %c0_10] : memref<1x64xf32, #tpu.memory_space<vmem>>, vector<1x64xf32>
    %13 = vector.broadcast %12 : vector<1x64xf32> to vector<8x64xf32>
    %14 = arith.addf %11, %13 : vector<8x64xf32>
    %cst_11 = arith.constant 0.000000e+00 : f32
    %15 = vector.broadcast %cst_11 : f32 to vector<8x64xf32>
    %16 = arith.maximumf %14, %15 : vector<8x64xf32>
    %17 = arith.truncf %16 : vector<8x64xf32> to vector<8x64xbf16>
    %c0_12 = arith.constant 0 : index
    %c0_13 = arith.constant 0 : index
    %18 = vector.load %arg6[%c0_12, %c0_13] : memref<64x128xbf16, #tpu.memory_space<vmem>>, vector<64x128xbf16>
    %cst_14 = arith.constant dense<0.000000e+00> : vector<8x128xf32>
    %19 = tpu.matmul %17, %18, %cst_14 {dimension_numbers = #tpu.dot_dimension_numbers<[1], [0], [0], [1], [0, 0, 1, 1], [], []>} : vector<8x64xbf16>, vector<64x128xbf16>, vector<8x128xf32> -> vector<8x128xf32>
    %c0_15 = arith.constant 0 : index
    %c0_16 = arith.constant 0 : index
    %20 = vector.load %arg7[%c0_15, %c0_16] : memref<1x128xf32, #tpu.memory_space<vmem>>, vector<1x128xf32>
    %21 = vector.broadcast %20 : vector<1x128xf32> to vector<8x128xf32>
    %22 = arith.addf %19, %21 : vector<8x128xf32>
    %c0_17 = arith.constant 0 : index
    %c0_18 = arith.constant 0 : index
    %23 = vector.load %arg8[%c0_17, %c0_18] : memref<8x128xf32, #tpu.memory_space<vmem>>, vector<8x128xf32>
    tpu.vector_store %arg8[%c0_17, %c0_18], %22 {strides = array<i32>} : memref<8x128xf32, #tpu.memory_space<vmem>>, vector<8x128xf32>,
    return
  }
  func.func @transform_0(%arg0: i32) -> (i32, i32) {
    %c0_i32 = arith.constant 0 : i32
    %c0_i32_0 = arith.constant 0 : i32
    return %arg0, %c0_i32 : i32, i32
  }
  func.func @transform_1(%arg0: i32) -> (i32, i32) {
    %c0_i32 = arith.constant 0 : i32
    %c0_i32_0 = arith.constant 0 : i32
    %c0_i32_1 = arith.constant 0 : i32
    return %c0_i32, %c0_i32_0 : i32, i32
  }
  func.func @transform_2(%arg0: i32) -> (i32, i32) {
    %c0_i32 = arith.constant 0 : i32
    %c0_i32_0 = arith.constant 0 : i32
    %c0_i32_1 = arith.constant 0 : i32
    return %c0_i32, %c0_i32_0 : i32, i32
  }
  func.func @transform_3(%arg0: i32) -> (i32, i32) {
    %c0_i32 = arith.constant 0 : i32
    %c0_i32_0 = arith.constant 0 : i32
    %c0_i32_1 = arith.constant 0 : i32
    return %c0_i32, %c0_i32_0 : i32, i32
  }
  func.func @transform_4(%arg0: i32) -> (i32, i32) {
    %c0_i32 = arith.constant 0 : i32
    %c0_i32_0 = arith.constant 0 : i32
    %c0_i32_1 = arith.constant 0 : i32
    return %c0_i32, %c0_i32_0 : i32, i32
  }
  func.func @transform_5(%arg0: i32) -> (i32, i32) {
    %c0_i32 = arith.constant 0 : i32
    %c0_i32_0 = arith.constant 0 : i32
    %c0_i32_1 = arith.constant 0 : i32
    return %c0_i32, %c0_i32_0 : i32, i32
  }
  func.func @transform_6(%arg0: i32) -> (i32, i32) {
    %c0_i32 = arith.constant 0 : i32
    %c0_i32_0 = arith.constant 0 : i32
    %c0_i32_1 = arith.constant 0 : i32
    return %c0_i32, %c0_i32_0 : i32, i32
  }
  func.func @transform_7(%arg0: i32) -> (i32, i32) {
    %c0_i32 = arith.constant 0 : i32
    %c0_i32_0 = arith.constant 0 : i32
    return %arg0, %c0_i32 : i32, i32
  }
}

</mosaic_0001>

<bundles_post_ra>
// kernel: tpu_custom_call.1
= control target key start
LH: loop header
LB: loop body
LE: loop exit
PB: predicated region body
PF: predicated region fallthrough
CT: control target
= control target key end

     0   :  { %12 = vsyncpa [#allocation3], 0  ;;  %s1267_s0 = inlined_call_operand.vmem [shape: f32[8,784], index: 0, kind: input, shape index: {}]   ;;  %s1268_s1 = inlined_call_operand.hbm [shape: bf16[784,128], index: 1, kind: input, shape index: {}]   ;;  %s1269_s2 = inlined_call_operand.vmem [shape: f32[1,128], index: 2, kind: input, shape index: {}]   ;;  %s1270_s3 = inlined_call_operand.vmem [shape: bf16[128,64], index: 3, kind: input, shape index: {}]   ;;  %s1271_s4 = inlined_call_operand.vmem [shape: f32[1,64], index: 4, kind: input, shape index: {}]   ;;  %s1272_s5 = inlined_call_operand.vmem [shape: bf16[64,128], index: 5, kind: input, shape index: {}]   ;;  %s1273_s6 = inlined_call_operand.vmem [shape: f32[1,128], index: 6, kind: input, shape index: {}]   ;;  %s1274_s7 = inlined_call_operand.hbm [shape: f32[8,128], index: 7, kind: output, shape index: {}]  }
   0x1   :  { %13 = vsyncpa [#allocation4], 0  ;;  %s1130_s24 = smov [#allocation2]  }
   0x2   :  { %s21_s25 = sshll.u32 %s1130_s24, 4  ;;  %s22_s25 = int_to_ptr.vmem [resolvable:$true] %s21_s25 }
   0x3   :  { %s1094_s26 = scalar_lea.vmem %s22_s25, 6272  ;;  %p1099_p1 = scmp.lt.s32.totalorder %s22_s25, %s22_s25 }
   0x4   :  { %p1095_p0 = scmp.ne.s32.totalorder %s22_s25, %s1094_s26  ;;  %p1100_p2 = scmp.lt.s32.totalorder %s1094_s26, %s1094_s26 }
   0x6   :  { %p1101_p3 = por %p1100_p2, %p1099_p1 }
   0x8   :  { %p1102_p4 = pnand %p1101_p3, %p1095_p0 }
   0xa   :  { %1105 = shalt.err (!%p1102_p4)
}
   0xb   :  { %s1131_s27 = smov 64   ;;  %s1132_s28 = smov 4  }
   0xc   :  { %27 = dma.hbm_to_vmem [thread:$0]  %s1268_s1, 6272, %s22_s25, [#allocation3], %s1131_s27, %s1131_s27, %s1132_s28  }
   0xd   :  { %1126 = dma.done.wait [#allocation3], 6272  }
   0xe   :  { %1127 = vsyncadd [#allocation3], 4294961024  ;;  %v1025_v0 = vld [vmem:[#allocation2 + $0x78] sm:$0xff]   ;;  %v1029_v4 = vld [vmem:[#allocation2 + $0x70] sm:$0xff]   ;;  %v1133_v44 = vmov 0.0   ;;  %vm1134_vm0 = vmmov 0  }
   0xf   :  { %v1026_v1 = vld [vmem:[#allocation2 + $0x38] sm:$0xff]   ;;  %899 = vmatprep.subr.bf16.mxu0 %v1025_v0  ;;  %v1030_v5 = vld [vmem:[#allocation2 + $0x30] sm:$0xff]   ;;  %v1033_v8 = vld [vmem:[#allocation2 + $0x68] sm:$0xff]   ;;  %vm455_vm1 = vcmask 130048   ;;  %vm773_vm2 = vcmask 523264   ;;  %s1135_s24 = smov [#allocation5]  }
  0x10   :  { %v1027_v2 = vld [vmem:[#allocation2 + $0xf8] sm:$0xff]   ;;  %900 = vmatpush3.bf16.msra.mxu0 %v1026_v1  ;;  %v1031_v6 = vld [vmem:[#allocation2 + $0xf0] sm:$0xff]   ;;  %v1034_v9 = vld [vmem:[#allocation2 + $0x28] sm:$0xff]  }
  0x11   :  { %v1028_v3 = vld [vmem:[#allocation2 + $0xb8] sm:$0xff]   ;;  %921 = vmatprep.subr.bf16.mxu1 %v1027_v2  ;;  %901 = vmatprep.subr.bf16.mxu0 %v1029_v4  ;;  %v1032_v7 = vld [vmem:[#allocation2 + $0xb0] sm:$0xff]   ;;  %v1035_v10 = vld [vmem:[#allocation2 + $0xe8] sm:$0xff]  }
  0x12   :  { %922 = vmatpush3.bf16.msra.mxu1 %v1028_v3  ;;  %v1036_v11 = vld [vmem:[#allocation2 + $0xa8] sm:$0xff]   ;;  %v1037_v12 = vld [vmem:[#allocation2 + $0x60] sm:$0xff]   ;;  %v1041_v16 = vld [vmem:[#allocation2 + $0x58] sm:$0xff]  }
  0x13   :  { %923 = vmatprep.subr.bf16.mxu1 %v1031_v6  ;;  %v1038_v13 = vld [vmem:[#allocation2 + $0x20] sm:$0xff]   ;;  %v1042_v17 = vld [vmem:[#allocation2 + $0x18] sm:$0xff]   ;;  %v1045_v20 = vld [vmem:[#allocation2 + $0x50] sm:$0xff]  }
  0x14   :  { %902 = vmatpush3.bf16.msra.mxu0 %v1030_v5  ;;  %v1039_v14 = vld [vmem:[#allocation2 + $0xe0] sm:$0xff]   ;;  %v1043_v18 = vld [vmem:[#allocation2 + $0xd8] sm:$0xff]   ;;  %v1046_v21 = vld [vmem:[#allocation2 + $0x10] sm:$0xff]  }
  0x15   :  { %903 = vmatprep.subr.bf16.mxu0 %v1033_v8  ;;  %v1040_v15 = vld [vmem:[#allocation2 + $0xa0] sm:$0xff]   ;;  %v1044_v19 = vld [vmem:[#allocation2 + $0x98] sm:$0xff]   ;;  %v1047_v22 = vld [vmem:[#allocation2 + $0xd0] sm:$0xff]  }
  0x16   :  { %924 = vmatpush3.bf16.msra.mxu1 %v1032_v7  ;;  %v1048_v23 = vld [vmem:[#allocation2 + $0x90] sm:$0xff]   ;;  %v1049_v24 = vld [vmem:[#allocation2 + $0x48] sm:$0xff]   ;;  %v1053_v28 = vld [vmem:[#allocation2 + $0x40] sm:$0xff]  }
  0x17   :  { %925 = vmatprep.subr.bf16.mxu1 %v1035_v10  ;;  %v1050_v25 = vld [vmem:[#allocation2 + $0x8] sm:$0xff]   ;;  %v1054_v29 = vld [vmem:[#allocation2] sm:$0xff]   ;;  %v1057_v36 = vld [vmem:[#allocation2 + $0x178] sm:$0xff]  }
  0x18   :  { %904 = vmatpush3.bf16.msra.mxu0 %v1034_v9  ;;  %v1051_v26 = vld [vmem:[#allocation2 + $0xc8] sm:$0xff]   ;;  %v1055_v30 = vld [vmem:[#allocation2 + $0xc0] sm:$0xff]   ;;  %v45_v37 = vld [vmem:[%s1267_s0 + $0x18] sm:$0xff] }
  0x19   :  { %905 = vmatprep.subr.bf16.mxu0 %v1037_v12  ;;  %v1052_v27 = vld [vmem:[#allocation2 + $0x88] sm:$0xff]   ;;  %v1056_v33 = vld [vmem:[#allocation2 + $0x80] sm:$0xff]   ;;  %v52_v38 = vpack.c.bf16 %v45_v37, %v45_v37  ;;  %v1058_v39 = vld [vmem:[#allocation2 + $0x138] sm:$0xff]  }
  0x1a   :  { %926 = vmatpush3.bf16.msra.mxu1 %v1036_v11  ;;  %v43_v31 = vld [vmem:[%s1267_s0 + $0x8] sm:$0xff]  ;;  %v42_v34 = vld [vmem:[%s1267_s0] sm:$0xff]  ;;  %v44_v40 = vld [vmem:[%s1267_s0 + $0x10] sm:$0xff] }
  0x1b   :  { %927 = vmatprep.subr.bf16.mxu1 %v1039_v14  ;;  %v50_v32 = vpack.c.bf16 %v43_v31, %v43_v31  ;;  %v49_v35 = vpack.c.bf16 %v42_v34, %v42_v34  ;;  %531 = vmatprep.mubr.bf16.mxu1 %v52_v38  ;;  %v51_v41 = vpack.c.bf16 %v44_v40, %v44_v40  ;;  %v1059_v42 = vld [vmem:[#allocation2 + $0x170] sm:$0xff]   ;;  %v1061_v45 = vld [vmem:[#allocation2 + $0x168] sm:$0xff]   ;;  %v1063_v47 = vld [vmem:[#allocation2 + $0x160] sm:$0xff]  }
  0x1c   :  { %906 = vmatpush3.bf16.msra.mxu0 %v1038_v13  ;;  %v1060_v43 = vld [vmem:[#allocation2 + $0x130] sm:$0xff]   ;;  %v1062_v46 = vld [vmem:[#allocation2 + $0x128] sm:$0xff]   ;;  %v1064_v48 = vld [vmem:[#allocation2 + $0x120] sm:$0xff]  }
  0x1d   :  { %907 = vmatprep.subr.bf16.mxu0 %v1041_v16  ;;  %491 = vmatprep.mubr.bf16.mxu0 %v50_v32  ;;  %v1065_v49 = vld [vmem:[#allocation2 + $0x158] sm:$0xff]   ;;  %v1067_v51 = vld [vmem:[#allocation2 + $0x150] sm:$0xff]   ;;  %v1073_v53 = vld [vmem:[#allocation2 + $0x180] sm:$0xff]  }
  0x1e   :  { %928 = vmatpush3.bf16.msra.mxu1 %v1040_v15  ;;  %v1066_v50 = vld [vmem:[#allocation2 + $0x118] sm:$0xff]   ;;  %v1068_v52 = vld [vmem:[#allocation2 + $0x110] sm:$0xff]   ;;  %v47_v54 = vld [vmem:[%s1267_s0 + $0x28] sm:$0xff] }
  0x1f   :  { %929 = vmatprep.subr.bf16.mxu1 %v1043_v18  ;;  %v1069_v55 = vld [vmem:[#allocation2 + $0x148] sm:$0xff]   ;;  %v54_v56 = vpack.c.bf16 %v47_v54, %v47_v54  ;;  %v48_v57 = vld [vmem:[%s1267_s0 + $0x30] sm:$0xff]  ;;  %v1071_v60 = vld [vmem:[#allocation2 + $0x140] sm:$0xff]  }
  0x20   :  { %908 = vmatpush3.bf16.msra.mxu0 %v1042_v17  ;;  %v55_v58 = vpack.c.bf16 %v48_v57, %v48_v57  ;;  %v1070_v59 = vld [vmem:[#allocation2 + $0x108] sm:$0xff]   ;;  %v1072_v61 = vld [vmem:[#allocation2 + $0x100] sm:$0xff]   ;;  %v1074_v0 = vld [vmem:[%s1270_s3 + $0x38] sm:$0xff]  }
  0x21   :  { %909 = vmatprep.subr.bf16.mxu0 %v1045_v20  ;;  %v46_v62 = vld [vmem:[%s1267_s0 + $0x20] sm:$0xff]  ;;  %v1075_v1 = vld [vmem:[%s1270_s3 + $0x30] sm:$0xff]   ;;  %v1076_v2 = vld [vmem:[%s1270_s3 + $0x28] sm:$0xff]  }
  0x22   :  { %930 = vmatpush3.bf16.msra.mxu1 %v1044_v19  ;;  %v53_v63 = vpack.c.bf16 %v46_v62, %v46_v62  ;;  %v1077_v3 = vld [vmem:[%s1270_s3 + $0x20] sm:$0xff]   ;;  %v1078_v4 = vld [vmem:[%s1270_s3 + $0x18] sm:$0xff]   ;;  %v1079_v5 = vld [vmem:[%s1270_s3 + $0x10] sm:$0xff]  }
  0x23   :  { %931 = vmatprep.subr.bf16.mxu1 %v1047_v22  ;;  %v1080_v6 = vld [vmem:[%s1270_s3 + $0x8] sm:$0xff]   ;;  %v1081_v7 = vld [vmem:[%s1270_s3] sm:$0xff]   ;;  %v1082_v8 = vld [vmem:[%s1272_s5 + $0x18] sm:$0xff]  }
  0x24   :  { %910 = vmatpush3.bf16.msra.mxu0 %v1046_v21  ;;  %v1083_v9 = vld [vmem:[%s1272_s5 + $0x10] sm:$0xff]   ;;  %v1085_v37 = vld [vmem:[%s1272_s5] sm:$0xff]  }
  0x25   :  { %911 = vmatprep.subr.bf16.mxu0 %v1049_v24  ;;  %v884_v38 = vld [vmem:[%s1271_s4] ss:$0 sm:$0xff] }
  0x26   :  { %932 = vmatpush3.bf16.msra.mxu1 %v1048_v23  ;;  %v833_v23 = vld [vmem:[%s1269_s2] ss:$0 sm:$0xff] }
  0x27   :  { %933 = vmatprep.subr.bf16.mxu1 %v1051_v26 }
  0x28   :  { %912 = vmatpush3.bf16.msra.mxu0 %v1050_v25 }
  0x29   :  { %913 = vmatprep.subr.bf16.mxu0 %v1053_v28 }
  0x2a   :  { %934 = vmatpush3.bf16.msra.mxu1 %v1052_v27 }
  0x2b   :  { %935 = vmatprep.subr.bf16.mxu1 %v1055_v30 }
  0x2c   :  { %914 = vmatpush3.bf16.msra.mxu0 %v1054_v29 }
  0x2d   :  { %943 = vmatprep.subr.bf16.mxu0 %v1057_v36  ;;  %v1084_v36 = vld [vmem:[%s1272_s5 + $0x8] sm:$0xff]   ;;  %s824_s5 = sshll.u32 %s1135_s24, 4  ;;  %s825_s5 = int_to_ptr.vmem [resolvable:$true] %s824_s5 }
  0x2e   :  { %936 = vmatpush3.bf16.msra.mxu1 %v1056_v33  ;;  %s1106_s4 = scalar_lea.vmem %s825_s5, 128  ;;  %p1111_p6 = scmp.lt.s32.totalorder %s825_s5, %s825_s5 }
  0x2f   :  { %492 = vmatmul.mubr.bf16.vlgmr.msra.gmra.mxu0 %v49_v35  ;;  %981 = vmatprep.subr.bf16.mxu1 %v1133_v44  ;;  %p1107_p5 = scmp.ne.s32.totalorder %s825_s5, %s1106_s4  ;;  %p1112_p7 = scmp.lt.s32.totalorder %s1106_s4, %s1106_s4 }
  0x30   :  { %944 = vmatpush3.bf16.msra.mxu0 %v1058_v39  ;;  %571 = vmatprep.mubr.bf16.mxu0 %v54_v56 }
  0x31   :  { %532 = vmatmul.mubr.bf16.vlgmr.msra.gmra.mxu1 %v51_v41  ;;  %945 = vmatprep.subr.bf16.mxu0 %v1059_v42  ;;  %p1113_p8 = por %p1112_p7, %p1111_p6 }
  0x32   :  { %983 = vmatprep.mubr.msk.bf16.mxu1 %vm1134_vm0, %v1133_v44  ;;  %982 = vmatpush3.bf16.msra.mxu1 %v1073_v53 }
  0x33   :  { %987 = vmatprep.subr.bf16.mxu1 %v1133_v44  ;;  %p1114_p9 = pnand %p1113_p8, %p1107_p5 }
  0x34   :  { %946 = vmatpush3.bf16.msra.mxu0 %v1060_v43 }
  0x35   :  { %947 = vmatprep.subr.bf16.mxu0 %v1061_v45 }
  0x38   :  { %948 = vmatpush3.bf16.msra.mxu0 %v1062_v46 }
  0x39   :  { %949 = vmatprep.subr.bf16.mxu0 %v1063_v47  ;;  %984 = vmatmul.mubr.msk.bf16.vlgmr.msra.gmra.mxu1 %vm455_vm1, %v55_v58 }
  0x3a   :  { %1003 = vmatprep.mubr.msk.bf16.mxu1 %vm1134_vm0, %v1133_v44  ;;  %988 = vmatpush3.bf16.msra.mxu1 %v1074_v0 }
  0x3b   :  { %989 = vmatprep.subr.bf16.mxu1 %v1133_v44 }
  0x3c   :  { %950 = vmatpush3.bf16.msra.mxu0 %v1064_v48 }
  0x3d   :  { %951 = vmatprep.subr.bf16.mxu0 %v1065_v49 }
  0x3e   :  { %990 = vmatpush3.bf16.msra.mxu1 %v1075_v1 }
  0x3f   :  { %991 = vmatprep.subr.bf16.mxu1 %v1133_v44 }
  0x40   :  { %952 = vmatpush3.bf16.msra.mxu0 %v1066_v50 }
  0x41   :  { %953 = vmatprep.subr.bf16.mxu0 %v1067_v51 }
  0x42   :  { %992 = vmatpush3.bf16.msra.mxu1 %v1076_v2 }
  0x43   :  { %993 = vmatprep.subr.bf16.mxu1 %v1133_v44 }
  0x44   :  { %954 = vmatpush3.bf16.msra.mxu0 %v1068_v52 }
  0x45   :  { %955 = vmatprep.subr.bf16.mxu0 %v1069_v55 }
  0x46   :  { %994 = vmatpush3.bf16.msra.mxu1 %v1077_v3 }
  0x47   :  { %995 = vmatprep.subr.bf16.mxu1 %v1133_v44 }
  0x48   :  { %956 = vmatpush3.bf16.msra.mxu0 %v1070_v59 }
  0x49   :  { %957 = vmatprep.subr.bf16.mxu0 %v1071_v60 }
  0x4a   :  { %996 = vmatpush3.bf16.msra.mxu1 %v1078_v4 }
  0x4b   :  { %997 = vmatprep.subr.bf16.mxu1 %v1133_v44 }
  0x4c   :  { %958 = vmatpush3.bf16.msra.mxu0 %v1072_v61 }
  0x4d   :  { %1007 = vmatprep.subr.bf16.mxu0 %v1133_v44 }
  0x4e   :  { %998 = vmatpush3.bf16.msra.mxu1 %v1079_v5 }
  0x4f   :  { %572 = vmatmul.mubr.bf16.vlgmr.msra.gmra.mxu0 %v53_v63  ;;  %999 = vmatprep.subr.bf16.mxu1 %v1133_v44 }
  0x50   :  { %1015 = vmatprep.mubr.msk.bf16.mxu0 %vm1134_vm0, %v1133_v44  ;;  %1008 = vmatpush3.bf16.msra.mxu0 %v1082_v8 }
  0x51   :  { %1009 = vmatprep.subr.bf16.mxu0 %v1133_v44 }
  0x52   :  { %1000 = vmatpush3.bf16.msra.mxu1 %v1080_v6 }
  0x53   :  { %1001 = vmatprep.subr.bf16.mxu1 %v1133_v44 }
  0x54   :  { %1010 = vmatpush3.bf16.msra.mxu0 %v1083_v9 }
  0x55   :  { %1011 = vmatprep.subr.bf16.mxu0 %v1133_v44 }
  0x56   :  { %1002 = vmatpush3.bf16.msra.mxu1 %v1081_v7 }
  0x58   :  { %1012 = vmatpush3.bf16.msra.mxu0 %v1084_v36 }
  0x59   :  { %1013 = vmatprep.subr.bf16.mxu0 %v1133_v44  ;;  %v893_v44 = vld [vmem:[%s1273_s6] ss:$0 sm:$0xff] }
  0x5c   :  { %1014 = vmatpush3.bf16.msra.mxu0 %v1085_v37 }
  0xef   :  { %v915_v10 = vpop.f32.mrf.mxu0 }
  0xf1   :  { %v916_v11 = vpop.f32.mrf.mxu0  ;;  %v937_v12 = vpop.f32.mrf.mxu1 }
  0xf2   :  { %v917_v22 = vadd.f32 %v916_v11, %v915_v10 }
  0xf3   :  { %v918_v13 = vpop.f32.mrf.mxu0  ;;  %v938_v14 = vpop.f32.mrf.mxu1 }
  0xf4   :  { %v494_v24 = vadd.f32 %v917_v22, %v833_v23  ;;  %v939_v25 = vadd.f32 %v938_v14, %v937_v12 }
  0xf5   :  { %v919_v15 = vpop.f32.mrf.mxu0  ;;  %v940_v16 = vpop.f32.mrf.mxu1 }
  0xf6   :  { %v534_v28 = vadd.f32 %v939_v25, %v494_v24 }
  0xf7   :  { %v941_v17 = vpop.f32.mrf.mxu1 }
  0xf9   :  { %v613_v18 = vpop.f32.mrf.mxu1 }
  0xfb   :  { %v985_v19 = vpop.f32.mrf.mxu1 }
  0xfd   :  { %v616_v20 = vpop.f32.mrf.mxu1 }
  0xff   :  { %v986_v21 = vpop.f32.mrf.mxu1 }
 0x10f   :  { %v959_v26 = vpop.f32.mrf.mxu0 }
 0x111   :  { %v960_v27 = vpop.f32.mrf.mxu0 }
 0x112   :  { %v961_v29 = vadd.f32 %v960_v27, %v959_v26 }
 0x113   :  { %v962_v30 = vpop.f32.mrf.mxu0 }
 0x114   :  { %v574_v31 = vadd.f32 %v961_v29, %v534_v28 }
 0x115   :  { %v963_v32 = vpop.f32.mrf.mxu0 }
 0x116   :  { %v614_v33 = vadd.f32 %v613_v18, %v574_v31 }
 0x118   :  { %v619_v34 = vmax.f32 %v614_v33, 0.0 }
 0x11a   :  { %v620_v35 = vpack.c.bf16 %v619_v34, %v619_v34 }
 0x11c   :  { %1004 = vmatmul.mubr.bf16.vlgmr.msra.gmra.mxu1 %v620_v35 }
 0x1dc   :  { %v726_v39 = vpop.f32.mrf.mxu1 }
 0x1dd   :  { %v727_v40 = vadd.f32 %v884_v38, %v726_v39 }
 0x1de   :  { %v1005_v41 = vpop.f32.mrf.mxu1 }
 0x1df   :  { %v732_v42 = vmax.f32 %v727_v40, 0.0 }
 0x1e0   :  { %v729_v43 = vpop.f32.mrf.mxu1 }
 0x1e1   :  { %v733_v45 = vpack.c.bf16 %v732_v42, %v732_v42 }
 0x1e2   :  { %v1006_v46 = vpop.f32.mrf.mxu1 }
 0x1e3   :  { %1016 = vmatmul.mubr.msk.bf16.vlgmr.msra.gmra.mxu0 %vm773_vm2, %v733_v45 }
 0x2a3   :  { %v811_v47 = vpop.f32.mrf.mxu0 }
 0x2a4   :  { %v812_v48 = vadd.f32 %v893_v44, %v811_v47 }
 0x2a5   :  { %v1017_v49 = vpop.f32.mrf.mxu0 }
 0x2a6   :  { %817 = vst [vmem:[#allocation5] sm:$0xff] %v812_v48 }
 0x2a7   :  { %v814_v50 = vpop.f32.mrf.mxu0 }
 0x2a8   :  { %1117 = shalt.err (!%p1114_p9)
}
 0x2a9   :  { %827 = dma.vmem_to_hbm [thread:$0]  %s825_s5, 128, %s1274_s7, [#allocation4]   ;;  %v1018_v51 = vpop.f32.mrf.mxu0 }
 0x2aa   :  { %1128 = dma.done.wait [#allocation4], 128  }
 0x2ab   :  { %1129 = vsyncadd [#allocation4], 4294967168 }
 0x2ac   :  { %831 = vsyncpa [#allocation3], 1 }
 0x2ad   :  { %832 = vsyncpa [#allocation4], 1 }

</bundles_post_ra>
